<compile_context>
chip_gen: v7x
topology: tpu7x:2x2x1
jax: 0.10.0
libtpu: 0.0.40
codegen_flags: <defaults>
</compile_context>

<pallas_src>
import math

import jax
import jax.numpy as jnp
from jax.experimental import pallas as pl
from jax.experimental.pallas import tpu as pltpu

_TWO_PI = 2.0 * math.pi


def _pos_emb_kernel(x_ref, w_ref, x_out_ref, sin_ref, cos_ref):
    # x_ref: (TILE_B, 1), w_ref: (1, half_dim)
    # outputs: x_out (TILE_B, 1), sin/cos (TILE_B, half_dim) — each lane-dense.
    x = x_ref[...]                                # (TILE_B, 1)
    w_scaled = w_ref[...] * _TWO_PI               # (1, half_dim): scale the row once
    freqs = x * w_scaled                          # broadcast outer product (TILE_B, half_dim)
    x_out_ref[...] = x
    sin_ref[...] = jnp.sin(freqs)
    cos_ref[...] = jnp.cos(freqs)


def random_or_learned_sinusoidal_pos_emb(x, weights, *, max_tile_b=512):
    """x: (B,) float32, weights: (half_dim,) float32 -> (B, 2*half_dim + 1)."""
    # TODO(synk): in production this tiny op should be fused into its consumer
    # (the diffusion time-MLP); standalone launch overhead dominates at these sizes.
    assert x.ndim == 1
    assert weights.ndim == 1
    B = x.shape[0]
    half_dim = weights.shape[0]

    # Row tile: multiple of 8 sublanes; pad B so the grid divides evenly.
    tile_b = min(max_tile_b, pl.cdiv(B, 8) * 8)
    b_pad = pl.cdiv(B, tile_b) * tile_b
    grid = (b_pad // tile_b,)

    x2 = jnp.zeros((b_pad, 1), jnp.float32).at[:B, 0].set(x.astype(jnp.float32))
    w2 = weights.reshape(1, half_dim).astype(jnp.float32)

    x_out, sin_out, cos_out = pl.pallas_call(
        _pos_emb_kernel,
        grid=grid,
        in_specs=(
            pl.BlockSpec((tile_b, 1), lambda i: (i, 0)),        # x rows (VMEM)
            pl.BlockSpec((1, half_dim), lambda i: (0, 0)),      # weights, replicated
        ),
        out_specs=(
            pl.BlockSpec((tile_b, 1), lambda i: (i, 0)),
            pl.BlockSpec((tile_b, half_dim), lambda i: (i, 0)),
            pl.BlockSpec((tile_b, half_dim), lambda i: (i, 0)),
        ),
        out_shape=(
            jax.ShapeDtypeStruct((b_pad, 1), jnp.float32),
            jax.ShapeDtypeStruct((b_pad, half_dim), jnp.float32),
            jax.ShapeDtypeStruct((b_pad, half_dim), jnp.float32),
        ),
        compiler_params=pltpu.CompilerParams(
            dimension_semantics=("parallel",)),   # rows split across TCs on v7x
    )(x2, w2)

    # Reassemble PyTorch column order [x | sin | cos] outside the kernel
    # (XLA handles this; keeps the kernel's stores lane-dense).
    out = jnp.concatenate([x_out, sin_out, cos_out], axis=-1)
    return out[:B]


def _reference(x, weights):
    x2 = x[..., None]
    freqs = x2 * weights[None, :] * 2.0 * math.pi
    return jnp.concatenate([x2, jnp.sin(freqs), jnp.cos(freqs)], axis=-1)


if __name__ == "__main__":
    key = jax.random.PRNGKey(0)
    kx, kw = jax.random.split(key)

    B = 8          # batch of timesteps
    dim = 32       # embedding dim (must be even)
    half_dim = dim // 2

    # Deterministic "randn" init for the module's weights parameter.
    weights = jax.random.normal(kw, (half_dim,), dtype=jnp.float32)
    # Timesteps (the usual input to this module).
    x = jax.random.uniform(kx, (B,), dtype=jnp.float32) * 100.0

    out = random_or_learned_sinusoidal_pos_emb(x, weights)
    out = jax.block_until_ready(out)

    ref = _reference(x, weights)
    assert out.shape == (B, dim + 1), out.shape
    # Tolerance covers the (mathematically equivalent) reassociated 2*pi scale.
    assert jnp.allclose(out, ref, atol=1e-4, rtol=1e-4), (
        float(jnp.max(jnp.abs(out - ref)))
    )

    print("KERNEL_OK")
</pallas_src>

<mosaic_0001>
module attributes {stable_mosaic.version = 11 : i64} {
  func.func @_pos_emb_kernel(%arg0: i32, %arg1: memref<8x1xf32, #tpu.memory_space<vmem>>, %arg2: memref<1x16xf32, #tpu.memory_space<vmem>>, %arg3: memref<8x1xf32, #tpu.memory_space<vmem>>, %arg4: memref<8x16xf32, #tpu.memory_space<vmem>>, %arg5: memref<8x16xf32, #tpu.memory_space<vmem>>) attributes {dimension_semantics = [#tpu.dimension_semantics<parallel>], iteration_bounds = array<i64: 1>, scalar_prefetch = 0 : i64, scratch_operands = 0 : i64, tpu.core_type = #tpu.core_type<tc>, window_params = [{transform_indices = @transform_0, window_bounds = array<i64: 8, 1>}, {pipeline_mode = #tpu.pipeline_mode<synchronous>, transform_indices = @transform_1, window_bounds = array<i64: 1, 16>}, {transform_indices = @transform_2, window_bounds = array<i64: 8, 1>}, {transform_indices = @transform_3, window_bounds = array<i64: 8, 16>}, {transform_indices = @transform_4, window_bounds = array<i64: 8, 16>}]} {
    %c0 = arith.constant 0 : index
    %c0_0 = arith.constant 0 : index
    %0 = vector.load %arg1[%c0, %c0_0] : memref<8x1xf32, #tpu.memory_space<vmem>>, vector<8x1xf32>
    %c0_1 = arith.constant 0 : index
    %c0_2 = arith.constant 0 : index
    %1 = vector.load %arg2[%c0_1, %c0_2] : memref<1x16xf32, #tpu.memory_space<vmem>>, vector<1x16xf32>
    %cst = arith.constant 6.28318548 : f32
    %2 = vector.broadcast %cst : f32 to vector<1x16xf32>
    %3 = arith.mulf %1, %2 : vector<1x16xf32>
    %4 = vector.broadcast %0 : vector<8x1xf32> to vector<8x16xf32>
    %5 = vector.broadcast %3 : vector<1x16xf32> to vector<8x16xf32>
    %6 = arith.mulf %4, %5 : vector<8x16xf32>
    %c0_3 = arith.constant 0 : index
    %c0_4 = arith.constant 0 : index
    %7 = vector.load %arg3[%c0_3, %c0_4] : memref<8x1xf32, #tpu.memory_space<vmem>>, vector<8x1xf32>
    tpu.vector_store %arg3[%c0_3, %c0_4], %0 {strides = array<i32>} : memref<8x1xf32, #tpu.memory_space<vmem>>, vector<8x1xf32>,
    %8 = math.sin %6 : vector<8x16xf32>
    %c0_5 = arith.constant 0 : index
    %c0_6 = arith.constant 0 : index
    %9 = vector.load %arg4[%c0_5, %c0_6] : memref<8x16xf32, #tpu.memory_space<vmem>>, vector<8x16xf32>
    tpu.vector_store %arg4[%c0_5, %c0_6], %8 {strides = array<i32>} : memref<8x16xf32, #tpu.memory_space<vmem>>, vector<8x16xf32>,
    %10 = math.cos %6 : vector<8x16xf32>
    %c0_7 = arith.constant 0 : index
    %c0_8 = arith.constant 0 : index
    %11 = vector.load %arg5[%c0_7, %c0_8] : memref<8x16xf32, #tpu.memory_space<vmem>>, vector<8x16xf32>
    tpu.vector_store %arg5[%c0_7, %c0_8], %10 {strides = array<i32>} : memref<8x16xf32, #tpu.memory_space<vmem>>, vector<8x16xf32>,
    return
  }
  func.func @transform_0(%arg0: i32) -> (i32, i32) {
    %c0_i32 = arith.constant 0 : i32
    %c0_i32_0 = arith.constant 0 : i32
    return %arg0, %c0_i32 : i32, i32
  }
  func.func @transform_1(%arg0: i32) -> (i32, i32) {
    %c0_i32 = arith.constant 0 : i32
    %c0_i32_0 = arith.constant 0 : i32
    %c0_i32_1 = arith.constant 0 : i32
    return %c0_i32, %c0_i32_0 : i32, i32
  }
  func.func @transform_2(%arg0: i32) -> (i32, i32) {
    %c0_i32 = arith.constant 0 : i32
    %c0_i32_0 = arith.constant 0 : i32
    return %arg0, %c0_i32 : i32, i32
  }
  func.func @transform_3(%arg0: i32) -> (i32, i32) {
    %c0_i32 = arith.constant 0 : i32
    %c0_i32_0 = arith.constant 0 : i32
    return %arg0, %c0_i32 : i32, i32
  }
  func.func @transform_4(%arg0: i32) -> (i32, i32) {
    %c0_i32 = arith.constant 0 : i32
    %c0_i32_0 = arith.constant 0 : i32
    return %arg0, %c0_i32 : i32, i32
  }
}

</mosaic_0001>

<bundles_post_ra>
// kernel: tpu_custom_call.1
= control target key start
LH: loop header
LB: loop body
LE: loop exit
PB: predicated region body
PF: predicated region fallthrough
CT: control target
= control target key end

     0   :  { %10 = vsyncpa [#allocation3], 0  ;;  %vm31_vm0 = vcmask 7168   ;;  %v349_v1 = vmov 0   ;;  %s439_s0 = inlined_call_operand.vmem [shape: f32[8,1], index: 0, kind: input, shape index: {}]   ;;  %s440_s1 = inlined_call_operand.vmem [shape: f32[1,16], index: 1, kind: input, shape index: {}]   ;;  %s441_s2 = inlined_call_operand.vmem [shape: f32[8,1], index: 2, kind: output, shape index: {0}]   ;;  %s442_s3 = inlined_call_operand.hbm [shape: f32[8,16], index: 3, kind: output, shape index: {1}]   ;;  %s443_s4 = inlined_call_operand.hbm [shape: f32[8,16], index: 4, kind: output, shape index: {2}]  }
   0x1   :  { %v16_v0 = vld [vmem:[%s439_s0] sm:$0xff]  ;;  %296 = vset.pattern.permute.xlu0 %v349_v1 }
   0x2   :  { %32 = vst.msk [vmem:[%s441_s2] sm:$0xff] %vm31_vm0, %v16_v0  ;;  %21 = vperm.xlu0 %296, %v16_v0  }
   0x3   :  { %11 = vsyncpa [#allocation5], 0  ;;  %v25_v2 = vlaneseq  ;;  %v17_v4 = vld [vmem:[%s440_s1] sm:$0x1]  ;;  %v350_v20 = vmov 683565275  }
   0x4   :  { %v18_v5 = vmul.f32 6.2831855, %v17_v4  ;;  %v351_v22 = vmov 2475754826   ;;  %v352_v25 = vmov 2131351028  }
   0x5   :  { %v26_v3 = vshrl.u32 %v25_v2, 7  ;;  %v353_v28 = vmov 2102212464   ;;  %v354_v31 = vmov 920167782   ;;  %vm137_vm11 = vcmask 130048  }
   0x6   :  { %v355_v34 = vmov 1326507024   ;;  %s356_s0 = smov [#allocation2]   ;;  %s357_s2 = smov [#allocation4]  }
   0x7   :  { %v27_v6 = vsub.s32 0, %v26_v3  ;;  %s251_s1 = sshll.u32 %s356_s0, 4  ;;  %s261_s21 = sshll.u32 %s357_s2, 4  ;;  %s252_s1 = int_to_ptr.vmem [resolvable:$true] %s251_s1  ;;  %s262_s21 = int_to_ptr.vmem [resolvable:$true] %s261_s21 }
   0x8   :  { %s301_s22 = scalar_lea.vmem %s252_s1, 128  ;;  %p306_p1 = scmp.lt.s32.totalorder %s252_s1, %s252_s1 }
   0x9   :  { %v28_v7 = vrot.slane %v18_v5, %v27_v6  ;;  %p302_p0 = scmp.ne.s32.totalorder %s252_s1, %s301_s22  ;;  %p307_p2 = scmp.lt.s32.totalorder %s301_s22, %s301_s22 }
   0xb   :  { %p308_p3 = por %p307_p2, %p306_p1 }
   0xd   :  { %p309_p4 = pnand %p308_p3, %p302_p0 }
  0x81   :  { %v22_v8 = vpop.permute.xlu0 %21 }
  0x82   :  { %v392_v9 = vmul.f32 %v28_v7, %v22_v8 }
  0x84   :  { %v36_v10 = vand.u32 2139095040, %v392_v9  ;;  %v33_v14 = vand.u32 2147483647, %v392_v9  ;;  %vm35_vm8 = vcmp.lt.s32.totalorder %v392_v9, 0 }
  0x86   :  { %v37_v11 = vshrl.u32 %v36_v10, 23  ;;  %v40_v17 = vand.u32 8388607, %v33_v14  ;;  %vm34_vm9 = vcmp.le.f32.partialorder %v33_v14, 0.7853982 }
  0x88   :  { %v275_v12 = vadd.s32 4294967169, %v37_v11  ;;  %v41_v36 = vor.u32 8388608, %v40_v17 }
  0x8a   :  { %v43_v13 = vadd.s32 1, %v275_v12  ;;  %v81_v50 = vshll.u32 %v41_v36, 8 }
  0x8c   :  { %vm44_vm1 = vcmp.gt.s32.totalorder %v43_v13, 0 }
  0x8d   :  { %v45_v15 = vsel %vm44_vm1, %v43_v13, 0  ;;  %vm125_vm1 = vweird.f32 %v392_v9 }
  0x8e   :  { %v47_v16 = vand.u32 31, %v45_v15  ;;  %v46_v19 = vshrl.u32 %v45_v15, 5 }
  0x90   :  { %v48_v18 = vsub.s32 32, %v47_v16  ;;  %v50_v21 = vshll.u32 %v350_v20, %v47_v16  ;;  %v53_v23 = vshll.u32 %v351_v22, %v47_v16  ;;  %v56_v27 = vshll.u32 %v352_v25, %v47_v16 }
  0x91   :  { %v59_v30 = vshll.u32 %v353_v28, %v47_v16  ;;  %v62_v33 = vshll.u32 %v354_v31, %v47_v16  ;;  %vm65_vm2 = vcmp.lt.s32.totalorder %v46_v19, 1  ;;  %vm68_vm3 = vcmp.lt.s32.totalorder %v46_v19, 4 }
  0x92   :  { %v51_v24 = vshrl.u32 %v351_v22, %v48_v18  ;;  %v54_v26 = vshrl.u32 %v352_v25, %v48_v18  ;;  %v57_v29 = vshrl.u32 %v353_v28, %v48_v18  ;;  %v60_v32 = vshrl.u32 %v354_v31, %v48_v18 }
  0x93   :  { %v63_v35 = vshrl.u32 %v355_v34, %v48_v18  ;;  %v49_v45 = vshrl.u32 %v350_v20, %v48_v18  ;;  %vm67_vm4 = vcmp.lt.s32.totalorder %v46_v19, 3  ;;  %vm66_vm5 = vcmp.lt.s32.totalorder %v46_v19, 2 }
  0x94   :  { %v52_v37 = vor.u32 %v51_v24, %v50_v21  ;;  %v55_v38 = vor.u32 %v54_v26, %v53_v23  ;;  %v58_v39 = vor.u32 %v57_v29, %v56_v27  ;;  %v61_v40 = vor.u32 %v60_v32, %v59_v30 }
  0x95   :  { %v64_v41 = vor.u32 %v63_v35, %v62_v33 }
  0x96   :  { %v70_v42 = vsel %vm68_vm3, %v58_v39, 2102212464  ;;  %v73_v43 = vsel %vm65_vm2, %v52_v37, %v55_v38  ;;  %v77_v44 = vsel %vm65_vm2, %v55_v38, %v58_v39  ;;  %v74_v46 = vsel %vm68_vm3, %v61_v40, 920167782 }
  0x97   :  { %v78_v47 = vsel %vm68_vm3, %v64_v41, 1326507024  ;;  %v75_v48 = vsel %vm67_vm4, %v58_v39, %v74_v46  ;;  %v69_v51 = vsel %vm65_vm2, %v49_v45, %v52_v37  ;;  %v71_v52 = vsel %vm67_vm4, %v55_v38, %v70_v42 }
  0x98   :  { %v79_v49 = vsel %vm67_vm4, %v61_v40, %v78_v47  ;;  %v76_v53 = vsel %vm66_vm5, %v73_v43, %v75_v48  ;;  %v72_v59 = vsel %vm66_vm5, %v69_v51, %v71_v52 }
  0x99   :  { %v80_v54 = vsel %vm66_vm5, %v77_v44, %v79_v49  ;;  %v401_v57 = vmul.u32.u64.low %v81_v50, %v76_v53  ;;  %v402_v58 = vmul.u32.u64.high %v81_v50, %v76_v53, %v401_v57  ;;  %v88_v61 = vmul.u32 %v81_v50, %v72_v59 }
  0x9a   :  { %v398_v55 = vmul.u32.u64.low %v81_v50, %v80_v54  ;;  %v399_v56 = vmul.u32.u64.high %v81_v50, %v80_v54, %v398_v55 }
  0x9b   :  { %v91_v60 = vadd.s32 1, %v402_v58 }
  0x9c   :  { %vm90_vm6 = vc.u32 %v399_v56, %v401_v57  ;;  %v89_v10 = vadd.s32 %v401_v57, %v399_v56 }
  0x9d   :  { %v92_v62 = vsel %vm90_vm6, %v91_v60, %v402_v58 }
  0x9e   :  { %v93_v63 = vadd.s32 %v92_v62, %v88_v61 }
  0xa0   :  { %v94_v0 = vadd.s32 536870912, %v93_v63 }
  0xa2   :  { %v95_v1 = vshrl.u32 %v94_v0, 30 }
  0xa4   :  { %v96_v2 = vshll.u32 %v95_v1, 30  ;;  %v119_v23 = vsub.s32 4, %v95_v1 }
  0xa6   :  { %v97_v3 = vsub.s32 %v93_v63, %v96_v2  ;;  %v120_v26 = vsel %vm35_vm8, %v119_v23, %v95_v1 }
  0xa7   :  { %v122_v28 = vsel %vm34_vm9, 0, %v120_v26 }
  0xa8   :  { %v99_v4 = vsub.s32 0, %v97_v3  ;;  %v126_v29 = vadd.s32 3, %v122_v28  ;;  %v232_v31 = vand.u32 3, %v122_v28 }
  0xaa   :  { %v276_v5 = vmin.u32 %v99_v4, %v97_v3  ;;  %v127_v30 = vand.u32 3, %v126_v29  ;;  %vm237_vm12 = vcmp.eq.s32.totalorder %v232_v31, 2  ;;  %vm234_vm14 = vcmp.eq.s32.totalorder %v232_v31, 0 }
  0xab   :  { %vm233_vm0 = vcmp.lt.s32.totalorder %v232_v31, 2 }
  0xac   :  { %v101_v6 = vclz %v276_v5  ;;  %vm132_vm10 = vcmp.eq.s32.totalorder %v127_v30, 2  ;;  %vm129_vm13 = vcmp.eq.s32.totalorder %v127_v30, 0  ;;  %vm128_vm15 = vcmp.lt.s32.totalorder %v127_v30, 2 }
  0xae   :  { %v277_v7 = vadd.s32 4294967294, %v101_v6 }
  0xb0   :  { %vm278_vm7 = vcmp.lt.s32.totalorder %v277_v7, 0 }
  0xb1   :  { %v104_v8 = vsel %vm278_vm7, 0, %v277_v7 }
  0xb2   :  { %v105_v11 = vsub.s32 32, %v104_v8  ;;  %v109_v12 = vsub.s32 4294967266, %v104_v8  ;;  %v106_v13 = vshll.u32 %v97_v3, %v104_v8 }
  0xb4   :  { %v107_v15 = vshrl.u32 %v89_v10, %v105_v11  ;;  %v110_v16 = vadd.s32 127, %v109_v12 }
  0xb6   :  { %v108_v17 = vor.u32 %v107_v15, %v106_v13  ;;  %v111_v18 = vshll.u32 %v110_v16, 23 }
  0xb8   :  { %v112_v19 = vor.u32 4788187, %v111_v18  ;;  %v115_v21 = vcvt.s32.f32 %v108_v17 }
  0xba   :  { %v113_v20 = vand.u32 2147483647, %v112_v19 }
  0xbc   :  { %v116_v22 = vmul.f32 %v115_v21, %v113_v20 }
  0xbe   :  { %v117_v24 = vxor.u32 2147483648, %v116_v22 }
  0xc0   :  { %v118_v25 = vsel %vm35_vm8, %v117_v24, %v116_v22 }
  0xc1   :  { %v121_v27 = vsel %vm34_vm9, %v392_v9, %v118_v25 }
  0xc2   :  { %297 = vcosq.f32 %v121_v27 }
  0xc3   :  { %299 = vsinq.f32 %v121_v27 }
  0xcc   :  { %v298_v32 = vpop.eup %297 }
  0xcd   :  { %v300_v33 = vpop.eup %299  ;;  %v133_v34 = vxor.u32 2147483648, %v298_v32 }
  0xce   :  { %v130_v35 = vxor.u32 2147483648, %v300_v33 }
  0xcf   :  { %v134_v14 = vsel %vm132_vm10, %v133_v34, %v300_v33  ;;  %v239_v36 = vsel %vm237_vm12, %v133_v34, %v300_v33 }
  0xd0   :  { %v131_v37 = vsel %vm129_vm13, %v298_v32, %v130_v35  ;;  %v236_v38 = vsel %vm234_vm14, %v298_v32, %v130_v35 }
  0xd1   :  { %v135_v39 = vsel %vm128_vm15, %v131_v37, %v134_v14  ;;  %v240_v40 = vsel %vm233_vm0, %v236_v38, %v239_v36 }
  0xd2   :  { %v136_v41 = vsel %vm125_vm1, nan, %v135_v39  ;;  %v241_v42 = vsel %vm125_vm1, nan, %v240_v40 }
  0xd3   :  { %138 = vst.msk [vmem:[#allocation2] sm:$0xff] %vm137_vm11, %v136_v41  ;;  %242 = vst.msk [vmem:[#allocation4] sm:$0xff] %vm137_vm11, %v241_v42 }
  0xd4   :  { %312 = shalt.err (!%p309_p4)
}
  0xd5   :  { %s313_s25 = scalar_lea.hbm %s442_s3, 128 }
  0xd6   :  { %p314_p5 = scmp.ne.s32.totalorder %s442_s3, %s313_s25  ;;  %p317_p6 = scmp.lt.u32.totalorder %s313_s25, %s442_s3 }
  0xd8   :  { %p319_p7 = pnand %p317_p6, %p314_p5 }
  0xda   :  { %322 = shalt.err (!%p319_p7)
}
  0xdb   :  { %254 = dma.vmem_to_hbm [thread:$0]  %s252_s1, 128, %s442_s3, [#allocation3]  }
  0xdc   :  { %s323_s6 = scalar_lea.vmem %s262_s21, 128  ;;  %p328_p9 = scmp.lt.s32.totalorder %s262_s21, %s262_s21 }
  0xdd   :  { %p324_p8 = scmp.ne.s32.totalorder %s262_s21, %s323_s6  ;;  %p329_p10 = scmp.lt.s32.totalorder %s323_s6, %s323_s6 }
  0xdf   :  { %p330_p11 = por %p329_p10, %p328_p9 }
  0xe1   :  { %p331_p12 = pnand %p330_p11, %p324_p8 }
  0xe3   :  { %334 = shalt.err (!%p331_p12)
}
  0xe4   :  { %s335_s9 = scalar_lea.hbm %s443_s4, 128 }
  0xe5   :  { %p336_p13 = scmp.ne.s32.totalorder %s443_s4, %s335_s9  ;;  %p339_p0 = scmp.lt.u32.totalorder %s335_s9, %s443_s4 }
  0xe7   :  { %p341_p1 = pnand %p339_p0, %p336_p13 }
  0xe9   :  { %344 = shalt.err (!%p341_p1)
}
  0xea   :  { %264 = dma.vmem_to_hbm [thread:$0]  %s262_s21, 128, %s443_s4, [#allocation5]  }
  0xeb   :  { %345 = dma.done.wait [#allocation3], 128  }
  0xec   :  { %346 = vsyncadd [#allocation3], 4294967168 }
  0xed   :  { %347 = dma.done.wait [#allocation5], 128  }
  0xee   :  { %348 = vsyncadd [#allocation5], 4294967168 }
  0xef   :  { %273 = vsyncpa [#allocation3], 1 }
  0xf0   :  { %274 = vsyncpa [#allocation5], 1 }

</bundles_post_ra>
